<compile_context>
chip_gen: v7x
topology: tpu7x:2x2x1
jax: 0.10.0
libtpu: 0.0.40
codegen_flags: <defaults>
</compile_context>

<pallas_src>
import jax
import jax.numpy as jnp
from jax.experimental import pallas as pl
from jax.experimental.pallas import tpu as pltpu


def mlp_kernel(xt_ref, w1t_ref, b1_ref, w2t_ref, b2_ref, out_ref):
    # xt_ref:  (F_in, TB)  input tile, batch on the 128-lane axis
    # w1t_ref: (U, F_in)   resident layer-1 weight (PyTorch (out,in) layout)
    # b1_ref:  (U, 1)      layer-1 bias, broadcast along lanes
    # w2t_ref: (1, U)      resident layer-2 weight row
    # b2_ref:  (1, 1)      layer-2 bias
    # out_ref: (1, TB)     lane-dense output slab
    h = jnp.dot(w1t_ref[...], xt_ref[...],
                preferred_element_type=jnp.float32)            # (U, TB)  MXU
    h = jnp.maximum(h + b1_ref[...], 0.0)                      # bias + ReLU (VPU)
    # Layer 2 on the MXU: (1, U) @ (U, TB) -> (1, TB). The MXU is nearly idle
    # (K=11 first layer), so this offloads the U-deep reduce from the VALU.
    y = jnp.dot(w2t_ref[...], h, preferred_element_type=jnp.float32) + b2_ref[...]
    out_ref[...] = y.astype(out_ref.dtype)


def mlp_forward(x, w1, b1, w2, b2, *, tile_b=16384):
    """relu(x @ w1 + b1) @ w2 + b2  (matches MLP.forward).

    x: (B, 11) f32; w1: (11, U); b1: (U,); w2: (U, 1); b2: (1,)
    (PyTorch nn.Linear weights pre-transposed to (in, out)).  Returns (B, 1).
    tile_b: batch tile; sweep 8192..65536 on large batches.
    """
    B, F_in = x.shape
    U = w1.shape[1]

    # Batch tile: multiple of 128 (lane-dense output slab), capped at tile_b
    # and at the (lane-rounded) batch size.
    B_ceil = pl.cdiv(B, 128) * 128
    TB = max(128, (min(tile_b, B_ceil) // 128) * 128)
    # v7x megacore: if a single tile would cover the whole batch but there is
    # room for two, split it so the "parallel" grid axis feeds both TensorCores.
    if TB == B_ceil and B_ceil >= 256:
        TB = pl.cdiv(B_ceil // 2, 128) * 128
    B_pad = pl.cdiv(B_ceil, TB) * TB
    n_tiles = B_pad // TB

    # Single fused transpose+pad pass (padded columns are zeros; they produce
    # relu(b1)@w2 + b2 in the kernel and are sliced off below).
    xt = x.astype(jnp.float32).T                     # (F_in, B)
    if B_pad > B:
        xt = jnp.pad(xt, ((0, 0), (0, B_pad - B)))   # (F_in, B_pad)

    w1t = w1.astype(jnp.float32).T                   # (U, F_in)
    b1c = b1.astype(jnp.float32).reshape(U, 1)
    w2t = w2.astype(jnp.float32).reshape(1, U)       # column vector -> row
    b2c = b2.astype(jnp.float32).reshape(1, 1)

    out_pad = pl.pallas_call(
        mlp_kernel,
        out_shape=jax.ShapeDtypeStruct((1, B_pad), jnp.float32),
        grid=(n_tiles,),
        in_specs=[
            # x tile: pipelined / double-buffered across the batch grid.
            pl.BlockSpec((F_in, TB), lambda i: (0, i)),
            # Weights / biases: constant index_map -> VMEM-resident.
            pl.BlockSpec((U, F_in), lambda i: (0, 0)),
            pl.BlockSpec((U, 1), lambda i: (0, 0)),
            pl.BlockSpec((1, U), lambda i: (0, 0)),
            pl.BlockSpec((1, 1), lambda i: (0, 0)),
        ],
        out_specs=pl.BlockSpec((1, TB), lambda i: (0, i)),
        compiler_params=pltpu.CompilerParams(
            # Independent batch tiles -> shard across both TensorCores on v7x;
            # harmless (single TC) on v5e/v6e.
            dimension_semantics=("parallel",),
            # Headroom for the (U, TB) hidden temporary + double-buffered IO
            # tiles at large TB; stays well under v7x's 64 MiB physical VMEM.
            vmem_limit_bytes=48 * 1024 * 1024,
        ),
    )(xt, w1t, b1c, w2t, b2c)

    return out_pad[0, :B].reshape(B, 1)


if __name__ == "__main__":
    key = jax.random.PRNGKey(0)

    def make_params(k, f_in, units):
        k_w1, k_b1, k_w2, k_b2 = jax.random.split(k, 4)
        w1 = jax.random.normal(k_w1, (f_in, units), dtype=jnp.float32) * 0.1
        b1 = jax.random.normal(k_b1, (units,), dtype=jnp.float32) * 0.1
        w2 = jax.random.normal(k_w2, (units, 1), dtype=jnp.float32) * 0.1
        b2 = jax.random.normal(k_b2, (1,), dtype=jnp.float32) * 0.1
        return w1, b1, w2, b2

    def ref_forward(x, w1, b1, w2, b2):
        return jnp.maximum(x @ w1 + b1, 0.0) @ w2 + b2

    fwd = jax.jit(mlp_forward)

    # (B=8, U=32): single-tile smoke test.  (B=300, U=100): multi-tile path
    # with batch padding and the module's default hidden width.
    for (B, units) in [(8, 32), (300, 100)]:
        k_x, k_p, key = jax.random.split(key, 3)
        x = jax.random.normal(k_x, (B, 11), dtype=jnp.float32)
        w1, b1, w2, b2 = make_params(k_p, 11, units)

        out = fwd(x, w1, b1, w2, b2)
        jax.block_until_ready(out)

        ref = ref_forward(x, w1, b1, w2, b2)
        assert out.shape == (B, 1)
        # Tolerance loose enough to cover MXU bf16-pass rounding of f32 matmuls.
        assert jnp.allclose(out, ref, atol=1e-2, rtol=1e-2), (
            float(jnp.max(jnp.abs(out - ref))))

    print("KERNEL_OK")
</pallas_src>

<mosaic_0001>
module attributes {stable_mosaic.version = 11 : i64} {
  func.func @mlp_kernel(%arg0: i32, %arg1: memref<11x128xf32, #tpu.memory_space<vmem>>, %arg2: memref<32x11xf32, #tpu.memory_space<vmem>>, %arg3: memref<32x1xf32, #tpu.memory_space<vmem>>, %arg4: memref<1x32xf32, #tpu.memory_space<vmem>>, %arg5: memref<1x1xf32, #tpu.memory_space<vmem>>, %arg6: memref<1x128xf32, #tpu.memory_space<vmem>>) attributes {dimension_semantics = [#tpu.dimension_semantics<parallel>], iteration_bounds = array<i64: 1>, scalar_prefetch = 0 : i64, scratch_operands = 0 : i64, tpu.core_type = #tpu.core_type<tc>, window_params = [{transform_indices = @transform_0, window_bounds = array<i64: 11, 128>}, {pipeline_mode = #tpu.pipeline_mode<synchronous>, transform_indices = @transform_1, window_bounds = array<i64: 32, 11>}, {pipeline_mode = #tpu.pipeline_mode<synchronous>, transform_indices = @transform_2, window_bounds = array<i64: 32, 1>}, {pipeline_mode = #tpu.pipeline_mode<synchronous>, transform_indices = @transform_3, window_bounds = array<i64: 1, 32>}, {pipeline_mode = #tpu.pipeline_mode<synchronous>, transform_indices = @transform_4, window_bounds = array<i64: 1, 1>}, {transform_indices = @transform_5, window_bounds = array<i64: 1, 128>}]} {
    %c0 = arith.constant 0 : index
    %c0_0 = arith.constant 0 : index
    %0 = vector.load %arg2[%c0, %c0_0] : memref<32x11xf32, #tpu.memory_space<vmem>>, vector<32x11xf32>
    %c0_1 = arith.constant 0 : index
    %c0_2 = arith.constant 0 : index
    %1 = vector.load %arg1[%c0_1, %c0_2] : memref<11x128xf32, #tpu.memory_space<vmem>>, vector<11x128xf32>
    %cst = arith.constant dense<0.000000e+00> : vector<32x128xf32>
    %2 = tpu.matmul %0, %1, %cst {dimension_numbers = #tpu.dot_dimension_numbers<[1], [0], [0], [1], [0, 0, 1, 1], [], []>} : vector<32x11xf32>, vector<11x128xf32>, vector<32x128xf32> -> vector<32x128xf32>
    %c0_3 = arith.constant 0 : index
    %c0_4 = arith.constant 0 : index
    %3 = vector.load %arg3[%c0_3, %c0_4] : memref<32x1xf32, #tpu.memory_space<vmem>>, vector<32x1xf32>
    %4 = vector.broadcast %3 : vector<32x1xf32> to vector<32x128xf32>
    %5 = arith.addf %2, %4 : vector<32x128xf32>
    %cst_5 = arith.constant 0.000000e+00 : f32
    %6 = vector.broadcast %cst_5 : f32 to vector<32x128xf32>
    %7 = arith.maximumf %5, %6 : vector<32x128xf32>
    %c0_6 = arith.constant 0 : index
    %c0_7 = arith.constant 0 : index
    %8 = vector.load %arg4[%c0_6, %c0_7] : memref<1x32xf32, #tpu.memory_space<vmem>>, vector<1x32xf32>
    %cst_8 = arith.constant dense<0.000000e+00> : vector<1x128xf32>
    %9 = tpu.matmul %8, %7, %cst_8 {dimension_numbers = #tpu.dot_dimension_numbers<[1], [0], [0], [1], [0, 0, 1, 1], [], []>} : vector<1x32xf32>, vector<32x128xf32>, vector<1x128xf32> -> vector<1x128xf32>
    %c0_9 = arith.constant 0 : index
    %c0_10 = arith.constant 0 : index
    %10 = vector.load %arg5[%c0_9, %c0_10] : memref<1x1xf32, #tpu.memory_space<vmem>>, vector<1x1xf32>
    %11 = vector.broadcast %10 : vector<1x1xf32> to vector<1x128xf32>
    %12 = arith.addf %9, %11 : vector<1x128xf32>
    %c0_11 = arith.constant 0 : index
    %c0_12 = arith.constant 0 : index
    %13 = vector.load %arg6[%c0_11, %c0_12] : memref<1x128xf32, #tpu.memory_space<vmem>>, vector<1x128xf32>
    tpu.vector_store %arg6[%c0_11, %c0_12], %12 {strides = array<i32>} : memref<1x128xf32, #tpu.memory_space<vmem>>, vector<1x128xf32>,
    return
  }
  func.func @transform_0(%arg0: i32) -> (i32, i32) {
    %c0_i32 = arith.constant 0 : i32
    %c0_i32_0 = arith.constant 0 : i32
    return %c0_i32, %arg0 : i32, i32
  }
  func.func @transform_1(%arg0: i32) -> (i32, i32) {
    %c0_i32 = arith.constant 0 : i32
    %c0_i32_0 = arith.constant 0 : i32
    %c0_i32_1 = arith.constant 0 : i32
    return %c0_i32, %c0_i32_0 : i32, i32
  }
  func.func @transform_2(%arg0: i32) -> (i32, i32) {
    %c0_i32 = arith.constant 0 : i32
    %c0_i32_0 = arith.constant 0 : i32
    %c0_i32_1 = arith.constant 0 : i32
    return %c0_i32, %c0_i32_0 : i32, i32
  }
  func.func @transform_3(%arg0: i32) -> (i32, i32) {
    %c0_i32 = arith.constant 0 : i32
    %c0_i32_0 = arith.constant 0 : i32
    %c0_i32_1 = arith.constant 0 : i32
    return %c0_i32, %c0_i32_0 : i32, i32
  }
  func.func @transform_4(%arg0: i32) -> (i32, i32) {
    %c0_i32 = arith.constant 0 : i32
    %c0_i32_0 = arith.constant 0 : i32
    %c0_i32_1 = arith.constant 0 : i32
    return %c0_i32, %c0_i32_0 : i32, i32
  }
  func.func @transform_5(%arg0: i32) -> (i32, i32) {
    %c0_i32 = arith.constant 0 : i32
    %c0_i32_0 = arith.constant 0 : i32
    return %c0_i32, %arg0 : i32, i32
  }
}

</mosaic_0001>

<bundles_post_ra>
// kernel: mlp_forward.1
= control target key start
LH: loop header
LB: loop body
LE: loop exit
PB: predicated region body
PF: predicated region fallthrough
CT: control target
= control target key end

     0   :  { %vm65_vm0 = vcmask 1042432   ;;  %vm52_vm1 = vcmask 89088   ;;  %vm305_vm2 = vmmov 1   ;;  %v306_v2 = vmov 0   ;;  %s383_s0 = inlined_call_operand.vmem [shape: f32[11,128], index: 0, kind: input, shape index: {}]   ;;  %s384_s1 = inlined_call_operand.vmem [shape: f32[32,11], index: 1, kind: input, shape index: {}]   ;;  %s385_s2 = inlined_call_operand.vmem [shape: f32[32,1], index: 2, kind: input, shape index: {}]   ;;  %s386_s4 = inlined_call_operand.<no memory space> [shape: f32[1,1], index: 4, kind: input, shape index: {}]   ;;  %s387_s3 = inlined_call_operand.vmem [shape: f32[1,32], index: 3, kind: input, shape index: {}]   ;;  %s388_s5 = inlined_call_operand.vmem [shape: f32[1,128], index: 5, kind: output, shape index: {}]  }
   0x1   :  { %v26_v0 = vld [vmem:[%s383_s0] sm:$0xff]  ;;  %v27_v1 = vld [vmem:[%s383_s0 + $0x8] sm:$0x7]  ;;  %vm287_vm3 = vmpackc.low %vm65_vm0, %vm305_vm2  ;;  %303 = vset.pattern.permute.xlu0 %v306_v2  ;;  %304 = vset.pattern.permute.xlu1 %v306_v2  ;;  %v10_v3 = vstv %s386_s4  ;;  %v307_v14 = vmov 0.0|0.0   ;;  %vm308_vm4 = vmmov 0   ;;  %v309_v15 = vmov 0.0  }
   0x2   :  { %v286_v4 = vpack.c.bf16 %v27_v1, %v26_v0  ;;  %v22_v5 = vld [vmem:[%s384_s1] sm:$0xff]  ;;  %11 = vst [vmem:[#allocation2] sm:$0x1] %v10_v3  ;;  %v30_v7 = vld [vmem:[%s385_s2 + $0x10] sm:$0xff]  ;;  %v23_v8 = vld [vmem:[%s384_s1 + $0x8] sm:$0xff]  ;;  %292 = vmatprep.subr.bf16.mxu1 %v307_v14  ;;  %283 = vmatprep.mubr.msk.f32.mxu1 %vm308_vm4, %v309_v15  ;;  %vm169_vm5 = vcmask 261120   ;;  %v165_v35 = vlaneseq }
   0x3   :  { %269 = vmatprep.mubr.msk.f32.mxu0 %vm52_vm1, %v22_v5  ;;  %v28_v6 = vld [vmem:[%s385_s2] sm:$0xff]  ;;  %v29_v9 = vld [vmem:[%s385_s2 + $0x8] sm:$0xff]  ;;  %44 = vperm.xlu1 %304, %v30_v7   ;;  %v24_v10 = vld [vmem:[%s384_s1 + $0x10] sm:$0xff] }
   0x4   :  { %288 = vmatprep.subr.msk.bf16.mxu0 %vm287_vm3, %v286_v4  ;;  %34 = vperm.xlu0 %303, %v28_v6   ;;  %v31_v11 = vld [vmem:[%s385_s2 + $0x18] sm:$0xff]  ;;  %v158_v34 = vld [vmem:[%s387_s3] sm:$0x1]  ;;  %v166_v36 = vshrl.u32 %v165_v35, 7 }
   0x5   :  { %291 = vmatpush3.bf16.msk.msra.mxu0 %vm287_vm3, %v286_v4  ;;  %v25_v12 = vld [vmem:[%s384_s1 + $0x18] sm:$0xff] }
   0x6   :  { %v167_v37 = vsub.s32 0, %v166_v36 }
   0x7   :  { %49 = vperm.xlu1 %304, %v31_v11  }
   0x8   :  { %270 = vmatmul.mubr.msk.f32.vlgmr.msra.gmra.mrb[0].mxu0 %vm52_vm1, %v23_v8  ;;  %39 = vperm.xlu0 %303, %v29_v9  }
   0x9   :  { %272 = vmatprep.mubr.msk.f32.mxu0 %vm52_vm1, %v24_v10  ;;  %v159_v13 = vld [vmem:[#allocation2] sm:$0x1] }
   0xc   :  { %273 = vmatmul.mubr.msk.f32.gmra.mrb[2].mxu0 %vm52_vm1, %v25_v12  ;;  %162 = vperm.xlu0 %303, %v159_v13  }
  0x82   :  { %v45_v17 = vpop.permute.xlu1 %44 }
  0x83   :  { %v35_v16 = vpop.permute.xlu0 %34 }
  0x86   :  { %v50_v24 = vpop.permute.xlu1 %49 }
  0x87   :  { %v40_v18 = vpop.permute.xlu0 %39 }
  0x8b   :  { %v163_v38 = vpop.permute.xlu0 %162 }
  0x8c   :  { %v168_v39 = vrot.slane %v163_v38, %v167_v37 }
  0xdb   :  { %v271_v19 = vpop.f32.mrb[0].mxu0 }
  0xdc   :  { %v141_v20 = vadd.f32 %v271_v19, %v40_v18  ;;  %v135_v21 = vpop.f32.mrb[1].mxu0 }
  0xdd   :  { %v136_v22 = vadd.f32 %v135_v21, %v35_v16 }
  0xde   :  { %v155_v23 = vmax.f32 %v141_v20, 0.0 }
  0xdf   :  { %v154_v25 = vmax.f32 %v136_v22, 0.0  ;;  %v274_v26 = vpop.f32.mrb[2].mxu0 }
  0xe0   :  { %v151_v27 = vadd.f32 %v274_v26, %v50_v24  ;;  %v145_v28 = vpop.f32.mrb[3].mxu0 }
  0xe1   :  { %v146_v29 = vadd.f32 %v145_v28, %v45_v17  ;;  %v293_v30 = vpack.c.bf16 %v155_v23, %v154_v25 }
  0xe2   :  { %v157_v31 = vmax.f32 %v151_v27, 0.0 }
  0xe3   :  { %v156_v32 = vmax.f32 %v146_v29, 0.0  ;;  %294 = vmatpush3.bf16.msra.mxu1 %v293_v30 }
  0xe4   :  { %295 = vmatprep.subr.bf16.mxu1 %v307_v14 }
  0xe5   :  { %v296_v33 = vpack.c.bf16 %v157_v31, %v156_v32 }
  0xe7   :  { %297 = vmatpush3.bf16.msra.mxu1 %v296_v33 }
  0xea   :  { %284 = vmatmul.mubr.msk.f32.vlgmr.msra.gmra.mrb[0].mxu1 %vm169_vm5, %v158_v34 }
 0x1bd   :  { %v239_v40 = vpop.f32.mrb[0].mxu1 }
 0x1be   :  { %v240_v41 = vadd.f32 %v239_v40, %v168_v39  ;;  %v285_v42 = vpop.f32.mrb[1].mxu1 }
 0x1c0   :  { %243 = vst [vmem:[%s388_s5] sm:$0x1] %v240_v41 }

</bundles_post_ra>
